<compile_context>
chip_gen: v7x
topology: tpu7x:2x2x1
jax: 0.10.0
libtpu: 0.0.40
codegen_flags: <defaults>
</compile_context>

<pallas_src>
import functools
import math

import jax
import jax.numpy as jnp
from jax.experimental import pallas as pl
from jax.experimental.pallas import tpu as pltpu


def _round_up(x, m):
    return (x + m - 1) // m * m


# ---------------------------------------------------------------------------
# Fused MLP kernel: entire layer stack in one kernel, grid over row tiles.
# ---------------------------------------------------------------------------
def _fused_mlp_kernel(*refs, num_layers):
    x_ref = refs[0]
    o_ref = refs[-1]
    wb_refs = refs[1:-1]                       # (w0, b0, w1, b1, ...)

    h = x_ref[...].astype(jnp.float32)
    for layer in range(num_layers):
        w = wb_refs[2 * layer][...].astype(jnp.float32)        # (K, N)
        b = wb_refs[2 * layer + 1][...].astype(jnp.float32)    # (1, N)
        h = jnp.dot(h, w, preferred_element_type=jnp.float32) + b
        if layer < num_layers - 1:
            h = jnp.maximum(h, 0.0)            # ReLU on every non-last layer
    o_ref[...] = h.astype(o_ref.dtype)


def _fused_mlp(x2d, weights, biases, *, out_dtype):
    M, d_in = x2d.shape
    num_layers = len(weights)
    d_out = weights[-1].shape[1]

    # Row tiling: keep blocks (8,128)-friendly and try to keep >=2 grid steps
    # so the "parallel" axis can shard across TensorCores on v7x.
    Mpad = _round_up(M, 8)
    if Mpad > 256:
        tm = 128
        Mpad = _round_up(M, tm)
    elif Mpad >= 16 and Mpad % 16 == 0:
        tm = Mpad // 2
    else:
        tm = Mpad

    if Mpad != M:
        x2d = jnp.pad(x2d, ((0, Mpad - M), (0, 0)))

    grid = (Mpad // tm,)

    in_specs = [pl.BlockSpec((tm, d_in), lambda i: (i, 0))]
    args = [x2d]
    flops = 0
    bytes_accessed = x2d.size * x2d.dtype.itemsize
    for w, b in zip(weights, biases):
        K, N = w.shape
        in_specs.append(pl.BlockSpec((K, N), lambda i: (0, 0)))   # weights stay resident
        in_specs.append(pl.BlockSpec((1, N), lambda i: (0, 0)))
        args.append(w)
        args.append(b.reshape(1, N))
        flops += 2 * Mpad * K * N
        bytes_accessed += (w.size + b.size) * w.dtype.itemsize
    bytes_accessed += Mpad * d_out * jnp.dtype(out_dtype).itemsize

    out = pl.pallas_call(
        functools.partial(_fused_mlp_kernel, num_layers=num_layers),
        out_shape=jax.ShapeDtypeStruct((Mpad, d_out), out_dtype),
        grid=grid,
        in_specs=in_specs,
        out_specs=pl.BlockSpec((tm, d_out), lambda i: (i, 0)),
        compiler_params=pltpu.CompilerParams(
            dimension_semantics=("parallel",),
            vmem_limit_bytes=48 * 1024 * 1024),
        cost_estimate=pl.CostEstimate(
            flops=flops, transcendentals=0, bytes_accessed=bytes_accessed),
    )(*args)
    return out[:M]


# ---------------------------------------------------------------------------
# Tiled Linear(+optional ReLU) kernel for the large-weight fallback path.
# K-reduction grid axis with a VMEM f32 accumulator (init/finalize via pl.when).
# ---------------------------------------------------------------------------
def _tiled_linear_kernel(x_ref, w_ref, b_ref, o_ref, acc_ref, *, apply_relu):
    @pl.when(pl.program_id(2) == 0)
    def _():
        acc_ref[...] = jnp.zeros_like(acc_ref)

    acc_ref[...] += jnp.dot(x_ref[...], w_ref[...],
                            preferred_element_type=jnp.float32)

    @pl.when(pl.program_id(2) == pl.num_programs(2) - 1)
    def _():
        r = acc_ref[...] + b_ref[...].astype(jnp.float32)
        if apply_relu:
            r = jnp.maximum(r, 0.0)
        o_ref[...] = r.astype(o_ref.dtype)


def _tiled_linear(x2d, w, b, *, apply_relu, out_dtype,
                  tm_max=256, tn_max=256, tk_max=512):
    # Note: tn_max=256 matches the v6e/v7x MXU; on v5e 128 is already a full
    # MXU pass.  Budgeted for v7x's 64 MiB VMEM (<=1.5 MiB per buffer here).
    M, K = x2d.shape
    Kw, N = w.shape
    assert K == Kw

    # --- M tiling (rows) ---
    Mpad = _round_up(M, 8)
    if Mpad > tm_max:
        tm = tm_max
        Mpad = _round_up(M, tm)
    else:
        tm = Mpad

    # --- N tiling (lane-dense output: multiples of 128 when possible) ---
    if N < 128:
        Npad, tn = N, N
    else:
        Npad = _round_up(N, 128)
        tn = tn_max if Npad % tn_max == 0 else 128

    # --- K tiling (reduction axis, last in the grid) ---
    if K < 128:
        Kpad, tk = K, K
    else:
        Kpad = _round_up(K, 128)
        if Kpad % tk_max == 0:
            tk = tk_max
        elif Kpad % 256 == 0:
            tk = 256
        else:
            tk = 128

    if (Mpad, Kpad) != (M, K):
        x2d = jnp.pad(x2d, ((0, Mpad - M), (0, Kpad - K)))
    if (Kpad, Npad) != (K, N):
        w = jnp.pad(w, ((0, Kpad - K), (0, Npad - N)))
    b2d = b.reshape(1, N)
    if Npad != N:
        b2d = jnp.pad(b2d, ((0, 0), (0, Npad - N)))

    grid = (Mpad // tm, Npad // tn, Kpad // tk)

    out = pl.pallas_call(
        functools.partial(_tiled_linear_kernel, apply_relu=apply_relu),
        out_shape=jax.ShapeDtypeStruct((Mpad, Npad), out_dtype),
        grid=grid,
        in_specs=[
            pl.BlockSpec((tm, tk), lambda i, j, k: (i, k)),
            pl.BlockSpec((tk, tn), lambda i, j, k: (k, j)),
            pl.BlockSpec((1, tn), lambda i, j, k: (0, j)),
        ],
        out_specs=pl.BlockSpec((tm, tn), lambda i, j, k: (i, j)),
        scratch_shapes=[pltpu.VMEM((tm, tn), jnp.float32)],
        compiler_params=pltpu.CompilerParams(
            dimension_semantics=("parallel", "parallel", "arbitrary"),
            vmem_limit_bytes=48 * 1024 * 1024),
        cost_estimate=pl.CostEstimate(
            flops=2 * Mpad * Kpad * Npad,
            transcendentals=0,
            bytes_accessed=(x2d.size + w.size + b2d.size) * 4 + Mpad * Npad * 4),
    )(x2d, w, b2d)
    return out[:M, :N]


# ---------------------------------------------------------------------------
# Public wrapper: MLP forward (matches the PyTorch module semantics).
# ---------------------------------------------------------------------------
def pallas_mlp(x, weights, biases, *, fuse_vmem_budget_bytes=24 * 1024 * 1024):
    """MLP forward.

    x:        (..., d0)
    weights:  list of (d_i, d_{i+1}) arrays (already transposed vs. torch,
              so each layer is h @ W + b)
    biases:   list of (d_{i+1},) arrays
    ReLU is applied after every layer except the last.
    """
    orig_shape = x.shape
    d_in = orig_shape[-1]
    x2d = x.reshape(-1, d_in)
    out_dtype = x.dtype
    d_out = weights[-1].shape[1]

    # If all weights/biases comfortably fit resident in VMEM, run the single
    # fused kernel; otherwise fall back to per-layer tiled matmuls.
    resident_bytes = sum(w.size + b.size for w, b in zip(weights, biases)) * 4
    if resident_bytes <= fuse_vmem_budget_bytes:
        y2d = _fused_mlp(x2d, weights, biases, out_dtype=out_dtype)
    else:
        h = x2d
        n_layers = len(weights)
        for i, (w, b) in enumerate(zip(weights, biases)):
            h = _tiled_linear(h, w, b, apply_relu=(i < n_layers - 1),
                              out_dtype=out_dtype)
        y2d = h
    return y2d.reshape(*orig_shape[:-1], d_out)


# ---------------------------------------------------------------------------
# Pure-JAX reference for validation
# ---------------------------------------------------------------------------
def mlp_reference(x, weights, biases):
    h = x
    n = len(weights)
    for i, (w, b) in enumerate(zip(weights, biases)):
        h = jnp.dot(h, w, precision=jax.lax.Precision.HIGHEST) + b
        if i < n - 1:
            h = jnp.maximum(h, 0.0)
    return h


# ---------------------------------------------------------------------------
if __name__ == "__main__":
    # Small shapes consistent with the module: MLP(dims=(32, 64, 32, 16)),
    # i.e. Linear+ReLU, Linear+ReLU, Linear.  Batch of 16 rows.
    batch = 16
    dims = (32, 64, 32, 16)

    key = jax.random.PRNGKey(0)
    keys = jax.random.split(key, 2 * (len(dims) - 1) + 1)
    x = jax.random.normal(keys[0], (batch, dims[0]), dtype=jnp.float32)

    weights, biases = [], []
    for i, (di, do) in enumerate(zip(dims[:-1], dims[1:])):
        bound = 1.0 / math.sqrt(di)   # nn.Linear default init range
        weights.append(jax.random.uniform(
            keys[1 + 2 * i], (di, do), jnp.float32, -bound, bound))
        biases.append(jax.random.uniform(
            keys[2 + 2 * i], (do,), jnp.float32, -bound, bound))

    # Fused single-kernel path (default for small/medium MLPs).
    y_fused = pallas_mlp(x, weights, biases)
    jax.block_until_ready(y_fused)

    # Force the tiled per-layer fallback path as well to validate it.
    y_tiled = pallas_mlp(x, weights, biases, fuse_vmem_budget_bytes=0)
    jax.block_until_ready(y_tiled)

    y_ref = mlp_reference(x, weights, biases)
    assert jnp.allclose(y_fused, y_ref, atol=1e-4, rtol=1e-4), "fused mismatch"
    assert jnp.allclose(y_tiled, y_ref, atol=1e-4, rtol=1e-4), "tiled mismatch"

    print("KERNEL_OK")
</pallas_src>

<mosaic_0001>
module attributes {stable_mosaic.version = 11 : i64} {
  func.func @_fused_mlp_kernel(%arg0: i32, %arg1: memref<8x32xf32, #tpu.memory_space<vmem>>, %arg2: memref<32x64xf32, #tpu.memory_space<vmem>>, %arg3: memref<1x64xf32, #tpu.memory_space<vmem>>, %arg4: memref<64x32xf32, #tpu.memory_space<vmem>>, %arg5: memref<1x32xf32, #tpu.memory_space<vmem>>, %arg6: memref<32x16xf32, #tpu.memory_space<vmem>>, %arg7: memref<1x16xf32, #tpu.memory_space<vmem>>, %arg8: memref<8x16xf32, #tpu.memory_space<vmem>>) attributes {dimension_semantics = [#tpu.dimension_semantics<parallel>], iteration_bounds = array<i64: 2>, scalar_prefetch = 0 : i64, scratch_operands = 0 : i64, tpu.core_type = #tpu.core_type<tc>, window_params = [{transform_indices = @transform_0, window_bounds = array<i64: 8, 32>}, {pipeline_mode = #tpu.pipeline_mode<synchronous>, transform_indices = @transform_1, window_bounds = array<i64: 32, 64>}, {pipeline_mode = #tpu.pipeline_mode<synchronous>, transform_indices = @transform_2, window_bounds = array<i64: 1, 64>}, {pipeline_mode = #tpu.pipeline_mode<synchronous>, transform_indices = @transform_3, window_bounds = array<i64: 64, 32>}, {pipeline_mode = #tpu.pipeline_mode<synchronous>, transform_indices = @transform_4, window_bounds = array<i64: 1, 32>}, {pipeline_mode = #tpu.pipeline_mode<synchronous>, transform_indices = @transform_5, window_bounds = array<i64: 32, 16>}, {pipeline_mode = #tpu.pipeline_mode<synchronous>, transform_indices = @transform_6, window_bounds = array<i64: 1, 16>}, {transform_indices = @transform_7, window_bounds = array<i64: 8, 16>}]} {
    %c0 = arith.constant 0 : index
    %c0_0 = arith.constant 0 : index
    %0 = vector.load %arg1[%c0, %c0_0] : memref<8x32xf32, #tpu.memory_space<vmem>>, vector<8x32xf32>
    %c0_1 = arith.constant 0 : index
    %c0_2 = arith.constant 0 : index
    %1 = vector.load %arg2[%c0_1, %c0_2] : memref<32x64xf32, #tpu.memory_space<vmem>>, vector<32x64xf32>
    %c0_3 = arith.constant 0 : index
    %c0_4 = arith.constant 0 : index
    %2 = vector.load %arg3[%c0_3, %c0_4] : memref<1x64xf32, #tpu.memory_space<vmem>>, vector<1x64xf32>
    %cst = arith.constant dense<0.000000e+00> : vector<8x64xf32>
    %3 = tpu.matmul %0, %1, %cst {dimension_numbers = #tpu.dot_dimension_numbers<[1], [0], [0], [1], [0, 0, 1, 1], [], []>} : vector<8x32xf32>, vector<32x64xf32>, vector<8x64xf32> -> vector<8x64xf32>
    %4 = vector.broadcast %2 : vector<1x64xf32> to vector<8x64xf32>
    %5 = arith.addf %3, %4 : vector<8x64xf32>
    %cst_5 = arith.constant 0.000000e+00 : f32
    %6 = vector.broadcast %cst_5 : f32 to vector<8x64xf32>
    %7 = arith.maximumf %5, %6 : vector<8x64xf32>
    %c0_6 = arith.constant 0 : index
    %c0_7 = arith.constant 0 : index
    %8 = vector.load %arg4[%c0_6, %c0_7] : memref<64x32xf32, #tpu.memory_space<vmem>>, vector<64x32xf32>
    %c0_8 = arith.constant 0 : index
    %c0_9 = arith.constant 0 : index
    %9 = vector.load %arg5[%c0_8, %c0_9] : memref<1x32xf32, #tpu.memory_space<vmem>>, vector<1x32xf32>
    %cst_10 = arith.constant dense<0.000000e+00> : vector<8x32xf32>
    %10 = tpu.matmul %7, %8, %cst_10 {dimension_numbers = #tpu.dot_dimension_numbers<[1], [0], [0], [1], [0, 0, 1, 1], [], []>} : vector<8x64xf32>, vector<64x32xf32>, vector<8x32xf32> -> vector<8x32xf32>
    %11 = vector.broadcast %9 : vector<1x32xf32> to vector<8x32xf32>
    %12 = arith.addf %10, %11 : vector<8x32xf32>
    %cst_11 = arith.constant 0.000000e+00 : f32
    %13 = vector.broadcast %cst_11 : f32 to vector<8x32xf32>
    %14 = arith.maximumf %12, %13 : vector<8x32xf32>
    %c0_12 = arith.constant 0 : index
    %c0_13 = arith.constant 0 : index
    %15 = vector.load %arg6[%c0_12, %c0_13] : memref<32x16xf32, #tpu.memory_space<vmem>>, vector<32x16xf32>
    %c0_14 = arith.constant 0 : index
    %c0_15 = arith.constant 0 : index
    %16 = vector.load %arg7[%c0_14, %c0_15] : memref<1x16xf32, #tpu.memory_space<vmem>>, vector<1x16xf32>
    %cst_16 = arith.constant dense<0.000000e+00> : vector<8x16xf32>
    %17 = tpu.matmul %14, %15, %cst_16 {dimension_numbers = #tpu.dot_dimension_numbers<[1], [0], [0], [1], [0, 0, 1, 1], [], []>} : vector<8x32xf32>, vector<32x16xf32>, vector<8x16xf32> -> vector<8x16xf32>
    %18 = vector.broadcast %16 : vector<1x16xf32> to vector<8x16xf32>
    %19 = arith.addf %17, %18 : vector<8x16xf32>
    %c0_17 = arith.constant 0 : index
    %c0_18 = arith.constant 0 : index
    %20 = vector.load %arg8[%c0_17, %c0_18] : memref<8x16xf32, #tpu.memory_space<vmem>>, vector<8x16xf32>
    tpu.vector_store %arg8[%c0_17, %c0_18], %19 {strides = array<i32>} : memref<8x16xf32, #tpu.memory_space<vmem>>, vector<8x16xf32>,
    return
  }
  func.func @transform_0(%arg0: i32) -> (i32, i32) {
    %c0_i32 = arith.constant 0 : i32
    %c0_i32_0 = arith.constant 0 : i32
    return %arg0, %c0_i32 : i32, i32
  }
  func.func @transform_1(%arg0: i32) -> (i32, i32) {
    %c0_i32 = arith.constant 0 : i32
    %c0_i32_0 = arith.constant 0 : i32
    %c0_i32_1 = arith.constant 0 : i32
    return %c0_i32, %c0_i32_0 : i32, i32
  }
  func.func @transform_2(%arg0: i32) -> (i32, i32) {
    %c0_i32 = arith.constant 0 : i32
    %c0_i32_0 = arith.constant 0 : i32
    %c0_i32_1 = arith.constant 0 : i32
    return %c0_i32, %c0_i32_0 : i32, i32
  }
  func.func @transform_3(%arg0: i32) -> (i32, i32) {
    %c0_i32 = arith.constant 0 : i32
    %c0_i32_0 = arith.constant 0 : i32
    %c0_i32_1 = arith.constant 0 : i32
    return %c0_i32, %c0_i32_0 : i32, i32
  }
  func.func @transform_4(%arg0: i32) -> (i32, i32) {
    %c0_i32 = arith.constant 0 : i32
    %c0_i32_0 = arith.constant 0 : i32
    %c0_i32_1 = arith.constant 0 : i32
    return %c0_i32, %c0_i32_0 : i32, i32
  }
  func.func @transform_5(%arg0: i32) -> (i32, i32) {
    %c0_i32 = arith.constant 0 : i32
    %c0_i32_0 = arith.constant 0 : i32
    %c0_i32_1 = arith.constant 0 : i32
    return %c0_i32, %c0_i32_0 : i32, i32
  }
  func.func @transform_6(%arg0: i32) -> (i32, i32) {
    %c0_i32 = arith.constant 0 : i32
    %c0_i32_0 = arith.constant 0 : i32
    %c0_i32_1 = arith.constant 0 : i32
    return %c0_i32, %c0_i32_0 : i32, i32
  }
  func.func @transform_7(%arg0: i32) -> (i32, i32) {
    %c0_i32 = arith.constant 0 : i32
    %c0_i32_0 = arith.constant 0 : i32
    return %arg0, %c0_i32 : i32, i32
  }
}

</mosaic_0001>

<bundles_post_ra>
// kernel: tpu_custom_call.1
= control target key start
LH: loop header
LB: loop body
LE: loop exit
PB: predicated region body
PF: predicated region fallthrough
CT: control target
= control target key end

     0   :  { %12 = vsyncpa [#allocation3], 0  ;;  %s1022_s0 = inlined_call_operand.vmem [shape: f32[16,32], index: 0, kind: input, shape index: {}]   ;;  %s1023_s1 = inlined_call_operand.vmem [shape: f32[32,64], index: 1, kind: input, shape index: {}]   ;;  %s1024_s2 = inlined_call_operand.vmem [shape: f32[1,64], index: 2, kind: input, shape index: {}]   ;;  %s1025_s3 = inlined_call_operand.vmem [shape: f32[64,32], index: 3, kind: input, shape index: {}]   ;;  %s1026_s4 = inlined_call_operand.vmem [shape: f32[1,32], index: 4, kind: input, shape index: {}]   ;;  %s1027_s5 = inlined_call_operand.vmem [shape: f32[32,16], index: 5, kind: input, shape index: {}]   ;;  %s1028_s6 = inlined_call_operand.vmem [shape: f32[1,16], index: 6, kind: input, shape index: {}]   ;;  %s1029_s7 = inlined_call_operand.hbm [shape: f32[16,16], index: 7, kind: output, shape index: {}]  }
   0x1   :  { %14 = vsyncpa [#allocation3 + $0x1], 0  ;;  %s860_s24 = smov 0   ;;  %s862_s25 = smov 0  }
   0x2   :  { %s864_s26 = smov 0   ;;  %s866_s27 = smov 0  }
   0x3 LB: > { %s881_s28 = sadd.s32 4294967295, %s814_s27   ;;  %s610_s29 = sadd.s32 4294967294, %s814_s27   ;;  %s814_s27 = sphi %s866_s27, %s1035_s27   ;;  %s810_s26 = sphi %s864_s26, %s1034_s26   ;;  %s806_s25 = sphi %s862_s25, %s1033_s25   ;;  %s802_s24 = sphi %s860_s24, %s1032_s24  }
   0x4   : > { %s885_s30 = sadd.s32 1, %s814_s27   ;;  %s179_s8 = sadd.s32 1, %s810_s26 }
   0x5   : > { %s176_s9 = ssub.s32 %s814_s27, %s885_s30  ;;  %p189_p0 = scmp.ne.s32.totalorder %s810_s26, %s806_s25 }
   0x6   : > { %p177_p1 = scmp.eq.s32.totalorder %s176_s9, 0  ;;  %p190_p2 = scmp.eq.s32.totalorder %s881_s28, 1 }
   0x7   : > { %p195_p3 = scmp.ne.s32.totalorder %s806_s25, %s802_s24  ;;  %p196_p4 = scmp.eq.s32.totalorder %s610_s29, 1 }
   0x8   : > { %s896_s10 = scalar_select %p177_p1, %s810_s26, %s179_s8  }
   0x9   : > { %p898_p5 = por %p190_p2, %p189_p0  ;;  %p902_p6 = por %p196_p4, %p195_p3 }
   0xa   : > { %p613_p7 = scmp.ge.s32.totalorder %s814_s27, 1  ;;  %p239_p8 = scmp.lt.s32.totalorder %s814_s27, 3 }
   0xc   : > { %p240_p9 = pnand %p613_p7, %p239_p8 }
   0xd   : > { %v275_v0 = vld [vmem:[%s1023_s1] sm:$0xff] (!%p240_p9)  ;;  %v276_v1 = vld [vmem:[%s1023_s1 + $0x8] sm:$0xff] (!%p240_p9)  ;;  %v277_v2 = vld [vmem:[%s1023_s1 + $0x10] sm:$0xff] (!%p240_p9)  ;;  %v816_v3 = vmov (!%p240_p9), 0.0|0.0   ;;  %vm817_vm0 = vmmov (!%p240_p9), 0   ;;  %v818_v6 = vmov (!%p240_p9), 0.0  }
   0xe   : > { %243 = sbr.rel (%p240_p9) target bundleno = 686 (0x2ae), region = 48  ;;  %686 = vmatprep.subr.bf16.mxu0 (!%p240_p9), %v816_v3  ;;  %v687_v4 = vpack.c.bf16 (!%p240_p9), %v276_v1, %v275_v0  ;;  %v278_v5 = vld [vmem:[%s1023_s1 + $0x18] sm:$0xff] (!%p240_p9)  ;;  %653 = vmatprep.mubr.msk.f32.mxu0 (!%p240_p9), %vm817_vm0, %v818_v6  ;;  %p270_p10 = scmp.lt.s32.totalorder (!%p240_p9), %s881_s28, 1  ;;  %v361_v7 = vld [vmem:[%s1025_s3] sm:$0xff] (!%p240_p9)  ;;  %v362_v8 = vld [vmem:[%s1025_s3 + $0x8] sm:$0xff] (!%p240_p9)  ;;  %vm286_vm1 = vcmask (!%p240_p9), 261120  }
   0xf   : > { %692 = vmatprep.subr.bf16.mxu1 (!%p240_p9), %v816_v3  ;;  %v693_v9 = vpack.c.bf16 (!%p240_p9), %v362_v8, %v361_v7  ;;  %v363_v10 = vld [vmem:[%s1025_s3 + $0x10] sm:$0xff] (!%p240_p9)  ;;  %v364_v11 = vld [vmem:[%s1025_s3 + $0x18] sm:$0xff] (!%p240_p9)  ;;  %672 = vmatprep.mubr.msk.f32.mxu1 (!%p240_p9), %vm817_vm0, %v818_v6  ;;  %v690_v12 = vpack.c.bf16 (!%p240_p9), %v278_v5, %v277_v2  ;;  %v365_v14 = vld [vmem:[%s1025_s3 + $0x20] sm:$0xff] (!%p240_p9)  ;;  %vm376_vm2 = vcmask (!%p240_p9), 523264   ;;  %s267_s9 = sand.u32 (!%p240_p9), 1, %s806_s25   ;;  %vm535_vm3 = vcmask (!%p240_p9), 130048  }
  0x10   : > { %688 = vmatpush3.bf16.msra.mxu0 (!%p240_p9), %v687_v4  ;;  %v696_v13 = vpack.c.bf16 (!%p240_p9), %v364_v11, %v363_v10  ;;  %v366_v15 = vld [vmem:[%s1025_s3 + $0x28] sm:$0xff] (!%p240_p9)  ;;  %v367_v18 = vld [vmem:[%s1025_s3 + $0x30] sm:$0xff] (!%p240_p9)  ;;  %v368_v19 = vld [vmem:[%s1025_s3 + $0x38] sm:$0xff] (!%p240_p9)  ;;  %s614_s13 = sshll.u32 (!%p240_p9), %s267_s9, 3  ;;  %s538_s22 = scalar_lea.sflag (!%p240_p9), [#allocation3], %s267_s9 }
  0x11   : > { %689 = vmatprep.subr.bf16.mxu0 (!%p240_p9), %v816_v3  ;;  %694 = vmatpush3.bf16.msra.mxu1 (!%p240_p9), %v693_v9  ;;  %v699_v17 = vpack.c.bf16 (!%p240_p9), %v366_v15, %v365_v14  ;;  %v702_v20 = vpack.c.bf16 (!%p240_p9), %v368_v19, %v367_v18  ;;  %v451_v21 = vld [vmem:[%s1027_s5] sm:$0xff] (!%p240_p9)  ;;  %v452_v22 = vld [vmem:[%s1027_s5 + $0x8] sm:$0xff] (!%p240_p9)  ;;  %v453_v29 = vld [vmem:[%s1027_s5 + $0x10] sm:$0xff] (!%p240_p9)  ;;  %s269_s17 = scalar_lea.vmem (!%p240_p9), [#allocation2], %s614_s13 }
  0x12   : > { %695 = vmatprep.subr.bf16.mxu1 (!%p240_p9), %v816_v3  ;;  %v705_v23 = vpack.c.bf16 (!%p240_p9), %v452_v22, %v451_v21  ;;  %v616_v24 = vld [vmem:[%s1024_s2] ss:$0 sm:$0xff] (!%p240_p9)  ;;  %v454_v30 = vld [vmem:[%s1027_s5 + $0x18] sm:$0xff] (!%p240_p9)  ;;  %s551_s18 = sshll.u32 (!%p240_p9), %s269_s17, 4  ;;  %s982_s18 = int_to_ptr.vmem [resolvable:$true] %s551_s18 }
  0x13   : > { %v708_v31 = vpack.c.bf16 (!%p240_p9), %v454_v30, %v453_v29  ;;  %v618_v32 = vld [vmem:[%s1026_s4] ss:$0 sm:$0xff] (!%p240_p9) }
  0x14   : > { %691 = vmatpush3.bf16.msra.mxu0 (!%p240_p9), %v690_v12  ;;  %v620_v37 = vld [vmem:[%s1028_s6] ss:$0 sm:$0xff] (!%p240_p9) }
  0x15   : > { %s271_s15 = scalar_select %p270_p10, %s881_s28, 1  ;;  %697 = vmatpush3.bf16.msra.mxu1 %v696_v13  ;;  %704 = vmatprep.subr.bf16.mxu0 %v816_v3 }
  0x16   : > { %698 = vmatprep.subr.bf16.mxu1 %v816_v3 }
  0x17   : > { %s615_s16 = sshll.u32 %s271_s15, 3 }
  0x18   : > { %s273_s23 = scalar_lea.vmem %s1022_s0, %s615_s16  ;;  %s623_s16 = sshll.u32 %s881_s28, 7 }
  0x19   : > { %v274_v16 = vld [vmem:[%s273_s23] sm:$0xff]  ;;  %700 = vmatpush3.bf16.msra.mxu1 %v699_v17  ;;  %s980_s21 = scalar_lea.hbm %s1029_s7, %s623_s16  ;;  %s752_s23 = scalar_lea.vmem %s982_s18, 128 }
  0x1a   : > { %654 = vmatmul.mubr.msk.f32.vlgmr.msra.gmra.mrb[0].mxu0 %vm286_vm1, %v274_v16  ;;  %701 = vmatprep.subr.bf16.mxu1 %v816_v3  ;;  %p753_p11 = scmp.ne.s32.totalorder %s982_s18, %s752_s23  ;;  %s819_s28 = smov [#allocation2]  }
  0x1b   : > { %683 = vmatprep.mubr.msk.f32.mxu0 %vm817_vm0, %v818_v6  ;;  %706 = vmatpush3.bf16.msra.mxu0 %v705_v23  ;;  %s756_s29 = sshll.u32 %s819_s28, 4  ;;  %s757_s29 = int_to_ptr.vmem [resolvable:$false] %s756_s29 }
  0x1c   : > { %707 = vmatprep.subr.bf16.mxu0 %v816_v3  ;;  %p754_p12 = pnand %p753_p11, %p898_p5  ;;  %s758_s8 = scalar_lea.vmem %s757_s29, 256 }
  0x1d   : > { %703 = vmatpush3.bf16.msra.mxu1 %v702_v20  ;;  %p759_p0 = scmp.lt.s32.totalorder %s982_s18, %s757_s29  ;;  %p760_p1 = scmp.lt.s32.totalorder %s758_s8, %s752_s23 }
  0x1e   : > { %p755_p13 = pneg %p754_p12 }
  0x1f   : > { %709 = vmatpush3.bf16.msra.mxu0 %v708_v31  ;;  %p761_p2 = por %p760_p1, %p759_p0 }
  0x21   : > { %p762_p3 = pnand %p761_p2, %p755_p13 }
  0xed   : > { %v356_v25 = vpop.f32.mrb[0].mxu0 }
  0xee   : > { %v357_v26 = vadd.f32 %v616_v24, %v356_v25  ;;  %v655_v27 = vpop.f32.mrb[1].mxu0 }
  0xf0   : > { %v360_v28 = vmax.f32 %v357_v26, 0.0 }
  0xf2   : > { %673 = vmatmul.mubr.msk.f32.vlgmr.msra.gmra.mrb[0].mxu1 %vm376_vm2, %v360_v28 }
 0x1c5   : > { %v446_v33 = vpop.f32.mrb[0].mxu1 }
 0x1c6   : > { %v447_v34 = vadd.f32 %v618_v32, %v446_v33  ;;  %v674_v35 = vpop.f32.mrb[1].mxu1 }
 0x1c8   : > { %v450_v36 = vmax.f32 %v447_v34, 0.0 }
 0x1ca   : > { %684 = vmatmul.mubr.msk.f32.vlgmr.msra.gmra.mrb[2].mxu0 %vm286_vm1, %v450_v36 }
 0x29d   : > { %v531_v38 = vpop.f32.mrb[2].mxu0 }
 0x29e   : > { %v532_v39 = vadd.f32 %v620_v37, %v531_v38  ;;  %v685_v40 = vpop.f32.mrb[3].mxu0 }
 0x2a0   : > { %536 = vst.msk [vmem:[%s269_s17] sm:$0xff] %vm535_vm3, %v532_v39 }
 0x2a1   : > { %765 = shalt.err (!%p762_p3)
}
 0x2a2   : > { %s766_s9 = scalar_lea.hbm %s980_s21, 128  ;;  %s770_s15 = scalar_lea.hbm %s1029_s7, 256 }
 0x2a3   : > { %p767_p4 = scmp.ne.s32.totalorder %s980_s21, %s766_s9  ;;  %p771_p9 = scmp.lt.u32.totalorder %s980_s21, %s1029_s7 }
 0x2a4   : > { %p772_p10 = scmp.lt.u32.totalorder %s770_s15, %s766_s9  ;;  %p774_p12 = scmp.lt.u32.totalorder %s766_s9, %s980_s21 }
 0x2a5   : > { %p768_p7 = pnand %p767_p4, %p898_p5 }
 0x2a6   : > { %p773_p11 = por %p772_p10, %p771_p9 }
 0x2a7   : > { %p769_p8 = pneg %p768_p7 }
 0x2a8   : > { %p775_p13 = por %p774_p12, %p773_p11 }
 0x2aa   : > { %p776_p0 = pnand %p775_p13, %p769_p8 }
 0x2ac   : > { %779 = shalt.err (!%p776_p0)
}
 0x2ad   : > { %710 = dma.vmem_to_hbm [thread:$0]  (%p898_p5), %s982_s18, 128, %s980_s21, %s538_s22  }
 0x2ae PF: > { %p716_p1 = scmp.ge.s32.totalorder %s814_s27, 2  ;;  %s563_s19 = sand.u32 1, %s802_s24  }
 0x2af   : > { %s564_s20 = scalar_lea.sflag [#allocation3], %s563_s19 }
 0x2b0   : > { %p713_p2 = pnand %p716_p1, %p902_p6 }
 0x2b2   : > { %797 = dma.done.wait (!%p713_p2), %s564_s20, 128  }
 0x2b3   : > { %799 = vsyncadd (!%p713_p2), %s564_s20, 4294967168  ;;  %p17_p3 = scmp.ge.s32.totalorder %s885_s30, 4   ;;  %s1032_s24 = smov %s806_s25 }
 0x2b4   : > { %s1033_s25 = smov %s810_s26  ;;  %s1034_s26 = smov %s896_s10 }
 0x2b5   : > { %s1035_s27 = smov %s885_s30  ;;  %19 = sbr.rel (!%p17_p3) target bundleno = 3 (0x3), region = 83 }
 0x2bc   :  { %569 = vsyncpa [#allocation3], 1 }
 0x2bd   :  { %571 = vsyncpa [#allocation3 + $0x1], 1 }

</bundles_post_ra>
